<compile_context>
chip_gen: v7x
topology: tpu7x:2x2x1
jax: 0.10.0
libtpu: 0.0.40
codegen_flags: <defaults>
</compile_context>

<pallas_src>
import jax
import jax.numpy as jnp
from jax.experimental import pallas as pl
from jax.experimental.pallas import tpu as pltpu

# Max tokens per grid step.  Multiple of 32 (covers f32/bf16/fp8 sublane
# packing).  Large enough to amortize the fixed per-step pipeline overhead.
_MAX_SEQ_TILE = 2048
# Conservative double-buffered VMEM budget (fits v5e's 16 MiB scoped default).
_VMEM_BUDGET_BYTES = 12 * 1024 * 1024


def _pick_tile(n_tokens: int, head_dim: int, out_bytes: int) -> int:
    """Choose the token-tile size TS."""
    if n_tokens <= _MAX_SEQ_TILE:
        # Block equals the full (flattened) token axis -> always a legal block.
        return n_tokens
    # 2 outputs x 2 pipeline buffers x TS x head_dim x bytes must fit budget.
    max_ts_by_vmem = _VMEM_BUDGET_BYTES // max(1, 4 * head_dim * out_bytes)
    ts = min(_MAX_SEQ_TILE, max_ts_by_vmem)
    ts = max(32, (ts // 32) * 32)   # sublane-aligned for all output dtypes
    return ts


def _make_rope_kernel(attention_scaling: float):
    scale = float(attention_scaling)

    def _rope_kernel(pos_ref, inv_ref, cos_ref, sin_ref):
        # pos_ref: (TS, 1) int32         -- flattened token positions
        # inv_ref: (1, head_dim) f32     -- inv_freq duplicated: [inv, inv]
        # cos_ref/sin_ref: (TS, head_dim) in output dtype
        pos = pos_ref[...].astype(jnp.float32)      # (TS, 1)
        emb = pos * inv_ref[...]                    # (TS, head_dim) lane-broadcast
        c = jnp.cos(emb)                            # EUP
        s = jnp.sin(emb)
        if scale != 1.0:                            # trace-time branch; 1.0 default
            c = c * scale
            s = s * scale
        # Cast right before the (single, lane-dense) store of each output.
        cos_ref[...] = c.astype(cos_ref.dtype)
        sin_ref[...] = s.astype(sin_ref.dtype)

    return _rope_kernel


def rotary_embedding(x, position_ids, inv_freq, attention_scaling=1.0):
    """Pallas equivalent of RotaryEmbedding.forward.

    x:            any array; only its dtype is used (like the PyTorch module).
    position_ids: (B, S) integer array
    inv_freq:     (half,) float32
    returns (cos, sin), each (B, S, 2*half) in x.dtype.
    """
    B, S = position_ids.shape
    half = inv_freq.shape[0]
    head_dim = 2 * half
    out_dtype = x.dtype
    out_bytes = jnp.dtype(out_dtype).itemsize

    # Flatten batch x sequence into one token axis.
    N = B * S
    TS = _pick_tile(N, head_dim, out_bytes)
    grid = (pl.cdiv(N, TS),)

    # Positions sublane-major: (N, 1) so pos * inv_freq is a lane broadcast.
    pos2 = position_ids.reshape(N, 1).astype(jnp.int32)
    # Pre-duplicate inv_freq: emb = pos * [inv, inv]  ==  concat(freqs, freqs).
    inv2 = jnp.concatenate([inv_freq, inv_freq], axis=0).reshape(1, head_dim)
    inv2 = inv2.astype(jnp.float32)

    out_shape = (
        jax.ShapeDtypeStruct((N, head_dim), out_dtype),
        jax.ShapeDtypeStruct((N, head_dim), out_dtype),
    )

    cos, sin = pl.pallas_call(
        _make_rope_kernel(attention_scaling),
        out_shape=out_shape,
        grid_spec=pltpu.PrefetchScalarGridSpec(
            num_scalar_prefetch=0,
            grid=grid,
            in_specs=[
                pl.BlockSpec((TS, 1), lambda t: (t, 0)),          # positions
                pl.BlockSpec((1, head_dim), lambda t: (0, 0)),     # inv_freq (shared)
            ],
            out_specs=[
                pl.BlockSpec((TS, head_dim), lambda t: (t, 0)),
                pl.BlockSpec((TS, head_dim), lambda t: (t, 0)),
            ],
        ),
        compiler_params=pltpu.CompilerParams(
            dimension_semantics=("parallel",),
        ),
    )(pos2, inv2)

    return cos.reshape(B, S, head_dim), sin.reshape(B, S, head_dim)


def compute_default_inv_freq(base, head_dim):
    # mirrors _compute_default_rope_parameters with partial_rotary_factor=1.0
    exponents = jnp.arange(0, head_dim, 2, dtype=jnp.float32) / float(head_dim)
    inv_freq = 1.0 / (base ** exponents)
    return inv_freq.astype(jnp.float32)


def rotary_embedding_ref(x, position_ids, inv_freq, attention_scaling=1.0):
    # pure-JAX reference for correctness checking
    pos = position_ids.astype(jnp.float32)                       # (B, S)
    freqs = pos[:, :, None] * inv_freq[None, None, :]            # (B, S, half)
    emb = jnp.concatenate([freqs, freqs], axis=-1)               # (B, S, head_dim)
    cos = jnp.cos(emb) * attention_scaling
    sin = jnp.sin(emb) * attention_scaling
    return cos.astype(x.dtype), sin.astype(x.dtype)


if __name__ == "__main__":
    # Small config: hidden_size=32, num_attention_heads=4 -> head_dim=8, half=4
    rope_theta = 1000000.0
    hidden_size = 32
    num_attention_heads = 4
    head_dim = hidden_size // num_attention_heads

    B, S = 2, 8
    key = jax.random.PRNGKey(0)
    kx, kp = jax.random.split(key)
    x = jax.random.normal(kx, (B, S, hidden_size), dtype=jnp.float32)
    position_ids = jnp.tile(jnp.arange(S, dtype=jnp.int32)[None, :], (B, 1))

    inv_freq = compute_default_inv_freq(rope_theta, head_dim)

    cos, sin = rotary_embedding(x, position_ids, inv_freq)
    cos = jax.block_until_ready(cos)
    sin = jax.block_until_ready(sin)

    cos_ref, sin_ref = rotary_embedding_ref(x, position_ids, inv_freq)
    assert cos.shape == (B, S, head_dim) and sin.shape == (B, S, head_dim)
    assert jnp.allclose(cos, cos_ref, atol=1e-5, rtol=1e-5)
    assert jnp.allclose(sin, sin_ref, atol=1e-5, rtol=1e-5)

    print("KERNEL_OK")
</pallas_src>

<mosaic_0001>
module attributes {stable_mosaic.version = 11 : i64} {
  func.func @_rope_kernel(%arg0: i32, %arg1: memref<16x1xi32, #tpu.memory_space<vmem>>, %arg2: memref<1x8xf32, #tpu.memory_space<vmem>>, %arg3: memref<16x8xf32, #tpu.memory_space<vmem>>, %arg4: memref<16x8xf32, #tpu.memory_space<vmem>>) attributes {dimension_semantics = [#tpu.dimension_semantics<parallel>], iteration_bounds = array<i64: 1>, scalar_prefetch = 0 : i64, scratch_operands = 0 : i64, tpu.core_type = #tpu.core_type<tc>, window_params = [{transform_indices = @transform_0, window_bounds = array<i64: 16, 1>}, {pipeline_mode = #tpu.pipeline_mode<synchronous>, transform_indices = @transform_1, window_bounds = array<i64: 1, 8>}, {transform_indices = @transform_2, window_bounds = array<i64: 16, 8>}, {transform_indices = @transform_3, window_bounds = array<i64: 16, 8>}]} {
    %c0 = arith.constant 0 : index
    %c0_0 = arith.constant 0 : index
    %0 = vector.load %arg1[%c0, %c0_0] : memref<16x1xi32, #tpu.memory_space<vmem>>, vector<16x1xi32>
    %1 = arith.sitofp %0 : vector<16x1xi32> to vector<16x1xf32>
    %c0_1 = arith.constant 0 : index
    %c0_2 = arith.constant 0 : index
    %2 = vector.load %arg2[%c0_1, %c0_2] : memref<1x8xf32, #tpu.memory_space<vmem>>, vector<1x8xf32>
    %3 = vector.broadcast %1 : vector<16x1xf32> to vector<16x8xf32>
    %4 = vector.broadcast %2 : vector<1x8xf32> to vector<16x8xf32>
    %5 = arith.mulf %3, %4 : vector<16x8xf32>
    %6 = math.cos %5 : vector<16x8xf32>
    %7 = math.sin %5 : vector<16x8xf32>
    %c0_3 = arith.constant 0 : index
    %c0_4 = arith.constant 0 : index
    %8 = vector.load %arg3[%c0_3, %c0_4] : memref<16x8xf32, #tpu.memory_space<vmem>>, vector<16x8xf32>
    tpu.vector_store %arg3[%c0_3, %c0_4], %6 {strides = array<i32>} : memref<16x8xf32, #tpu.memory_space<vmem>>, vector<16x8xf32>,
    %c0_5 = arith.constant 0 : index
    %c0_6 = arith.constant 0 : index
    %9 = vector.load %arg4[%c0_5, %c0_6] : memref<16x8xf32, #tpu.memory_space<vmem>>, vector<16x8xf32>
    tpu.vector_store %arg4[%c0_5, %c0_6], %7 {strides = array<i32>} : memref<16x8xf32, #tpu.memory_space<vmem>>, vector<16x8xf32>,
    return
  }
  func.func @transform_0(%arg0: i32) -> (i32, i32) {
    %c0_i32 = arith.constant 0 : i32
    %c0_i32_0 = arith.constant 0 : i32
    return %arg0, %c0_i32 : i32, i32
  }
  func.func @transform_1(%arg0: i32) -> (i32, i32) {
    %c0_i32 = arith.constant 0 : i32
    %c0_i32_0 = arith.constant 0 : i32
    %c0_i32_1 = arith.constant 0 : i32
    return %c0_i32, %c0_i32_0 : i32, i32
  }
  func.func @transform_2(%arg0: i32) -> (i32, i32) {
    %c0_i32 = arith.constant 0 : i32
    %c0_i32_0 = arith.constant 0 : i32
    return %arg0, %c0_i32 : i32, i32
  }
  func.func @transform_3(%arg0: i32) -> (i32, i32) {
    %c0_i32 = arith.constant 0 : i32
    %c0_i32_0 = arith.constant 0 : i32
    return %arg0, %c0_i32 : i32, i32
  }
}

</mosaic_0001>

<bundles_post_ra>
// kernel: tpu_custom_call.1
= control target key start
LH: loop header
LB: loop body
LE: loop exit
PB: predicated region body
PF: predicated region fallthrough
CT: control target
= control target key end

     0   :  { %v504_v0 = vmov 0   ;;  %v505_v26 = vmov 683565275   ;;  %v506_v30 = vmov 2475754826   ;;  %s616_s0 = inlined_call_operand.vmem [shape: s32[16,1], index: 0, kind: input, shape index: {}]   ;;  %s617_s1 = inlined_call_operand.vmem [shape: f32[1,8], index: 1, kind: input, shape index: {}]   ;;  %s618_s2 = inlined_call_operand.vmem [shape: f32[16,8], index: 2, kind: output, shape index: {0}]   ;;  %s619_s3 = inlined_call_operand.vmem [shape: f32[16,8], index: 3, kind: output, shape index: {1}]  }
   0x1   :  { %495 = vset.pattern.permute.xlu0 %v504_v0  ;;  %v13_v1 = vld [vmem:[%s616_s0] sm:$0xff]  ;;  %v14_v2 = vld [vmem:[%s616_s0 + $0x8] sm:$0xff]  ;;  %v507_v32 = vmov 2131351028   ;;  %v508_v34 = vmov 2102212464  }
   0x2   :  { %v15_v3 = vcvt.s32.f32 %v13_v1  ;;  %v16_v4 = vcvt.s32.f32 %v14_v2  ;;  %v463_v5 = vld [vmem:[%s617_s1] ss:$0 sm:$0xff]  ;;  %v509_v36 = vmov 920167782   ;;  %v510_v43 = vmov 1326507024  }
   0x4   :  { %20 = vperm.xlu0 %495, %v15_v3  }
   0x8   :  { %25 = vperm.xlu0 %495, %v16_v4  }
  0x83   :  { %v21_v6 = vpop.permute.xlu0 %20 }
  0x84   :  { %v540_v7 = vmul.f32 %v463_v5, %v21_v6 }
  0x86   :  { %v36_v8 = vand.u32 2147483647, %v540_v7  ;;  %v39_v9 = vand.u32 2139095040, %v540_v7  ;;  %vm38_vm14 = vcmp.lt.s32.totalorder %v540_v7, 0 }
  0x87   :  { %v26_v10 = vpop.permute.xlu0 %25 }
  0x88   :  { %v40_v11 = vshrl.u32 %v39_v9, 23  ;;  %v544_v12 = vmul.f32 %v463_v5, %v26_v10  ;;  %v43_v13 = vand.u32 8388607, %v36_v8  ;;  %vm37_vm15 = vcmp.le.f32.partialorder %v36_v8, 0.7853982 }
  0x8a   :  { %v464_v14 = vadd.s32 4294967169, %v40_v11  ;;  %v142_v15 = vand.u32 2139095040, %v544_v12  ;;  %v44_v17 = vor.u32 8388608, %v43_v13  ;;  %v139_v19 = vand.u32 2147483647, %v544_v12 }
  0x8c   :  { %v46_v16 = vadd.s32 1, %v464_v14  ;;  %v143_v18 = vshrl.u32 %v142_v15, 23  ;;  %v550_v24 = vshll.u32 %v44_v17, 8  ;;  %v146_v28 = vand.u32 8388607, %v139_v19 }
  0x8e   :  { %vm47_vm0 = vcmp.gt.s32.totalorder %v46_v16, 0  ;;  %v468_v21 = vadd.s32 4294967169, %v143_v18  ;;  %v147_v58 = vor.u32 8388608, %v146_v28 }
  0x8f   :  { %v48_v20 = vsel %vm47_vm0, %v46_v16, 0  ;;  %vm141_vm0 = vcmp.lt.s32.totalorder %v544_v12, 0 }
  0x90   :  { %v49_v22 = vshrl.u32 %v48_v20, 5  ;;  %v50_v23 = vand.u32 31, %v48_v20  ;;  %v149_v29 = vadd.s32 1, %v468_v21  ;;  %v187_v9 = vshll.u32 %v147_v58, 8 }
  0x92   :  { %v51_v25 = vsub.s32 32, %v50_v23  ;;  %v53_v27 = vshll.u32 %v505_v26, %v50_v23  ;;  %v56_v31 = vshll.u32 %v506_v30, %v50_v23  ;;  %v59_v33 = vshll.u32 %v507_v32, %v50_v23 }
  0x93   :  { %v62_v35 = vshll.u32 %v508_v34, %v50_v23  ;;  %v65_v37 = vshll.u32 %v509_v36, %v50_v23  ;;  %vm68_vm1 = vcmp.lt.s32.totalorder %v49_v22, 1  ;;  %vm70_vm2 = vcmp.lt.s32.totalorder %v49_v22, 3 }
  0x94   :  { %v54_v38 = vshrl.u32 %v506_v30, %v51_v25  ;;  %v57_v39 = vshrl.u32 %v507_v32, %v51_v25  ;;  %v60_v40 = vshrl.u32 %v508_v34, %v51_v25  ;;  %v52_v41 = vshrl.u32 %v505_v26, %v51_v25 }
  0x95   :  { %v63_v42 = vshrl.u32 %v509_v36, %v51_v25  ;;  %v66_v44 = vshrl.u32 %v510_v43, %v51_v25  ;;  %vm150_vm3 = vcmp.gt.s32.totalorder %v149_v29, 0  ;;  %vm71_vm4 = vcmp.lt.s32.totalorder %v49_v22, 4 }
  0x96   :  { %v55_v45 = vor.u32 %v54_v38, %v53_v27  ;;  %v58_v46 = vor.u32 %v57_v39, %v56_v31  ;;  %v61_v47 = vor.u32 %v60_v40, %v59_v33  ;;  %v151_v50 = vsel %vm150_vm3, %v149_v29, 0 }
  0x97   :  { %v64_v48 = vor.u32 %v63_v42, %v62_v35  ;;  %v67_v49 = vor.u32 %v66_v44, %v65_v37  ;;  %vm69_vm5 = vcmp.lt.s32.totalorder %v49_v22, 2  ;;  %v153_v61 = vand.u32 31, %v151_v50 }
  0x98   :  { %v72_v51 = vsel %vm68_vm1, %v52_v41, %v55_v45  ;;  %v73_v52 = vsel %vm71_vm4, %v61_v47, 2102212464  ;;  %v76_v53 = vsel %vm68_vm1, %v55_v45, %v58_v46  ;;  %v80_v54 = vsel %vm68_vm1, %v58_v46, %v61_v47 }
  0x99   :  { %v74_v55 = vsel %vm70_vm2, %v58_v46, %v73_v52  ;;  %v77_v56 = vsel %vm71_vm4, %v64_v48, 920167782  ;;  %v81_v57 = vsel %vm71_vm4, %v67_v49, 1326507024  ;;  %v152_v5 = vshrl.u32 %v151_v50, 5 }
  0x9a   :  { %v78_v59 = vsel %vm70_vm2, %v61_v47, %v77_v56  ;;  %v82_v60 = vsel %vm70_vm2, %v64_v48, %v81_v57  ;;  %v75_v62 = vsel %vm69_vm5, %v72_v51, %v74_v55  ;;  %v154_v6 = vsub.s32 32, %v153_v61 }
  0x9b   :  { %v79_v63 = vsel %vm69_vm5, %v76_v53, %v78_v59  ;;  %v83_v0 = vsel %vm69_vm5, %v80_v54, %v82_v60  ;;  %v91_v10 = vmul.u32 %v550_v24, %v75_v62  ;;  %v156_v11 = vshll.u32 %v505_v26, %v153_v61 }
  0x9c   :  { %v563_v1 = vmul.u32.u64.low %v550_v24, %v83_v0  ;;  %v564_v2 = vmul.u32.u64.high %v550_v24, %v83_v0, %v563_v1  ;;  %v567_v3 = vmul.u32.u64.low %v550_v24, %v79_v63  ;;  %v568_v4 = vmul.u32.u64.high %v550_v24, %v79_v63, %v567_v3 }
  0x9d   :  { %v159_v13 = vshll.u32 %v506_v30, %v153_v61  ;;  %v162_v14 = vshll.u32 %v507_v32, %v153_v61  ;;  %v157_v15 = vshrl.u32 %v506_v30, %v154_v6  ;;  %v160_v16 = vshrl.u32 %v507_v32, %v154_v6 }
  0x9e   :  { %v163_v17 = vshrl.u32 %v508_v34, %v154_v6  ;;  %v165_v18 = vshll.u32 %v508_v34, %v153_v61  ;;  %vm93_vm6 = vc.u32 %v564_v2, %v567_v3  ;;  %v94_v20 = vadd.s32 1, %v568_v4 }
  0x9f   :  { %v166_v21 = vshrl.u32 %v509_v36, %v154_v6  ;;  %v168_v22 = vshll.u32 %v509_v36, %v153_v61  ;;  %v158_v23 = vor.u32 %v157_v15, %v156_v11  ;;  %v161_v25 = vor.u32 %v160_v16, %v159_v13 }
  0xa0   :  { %v164_v27 = vor.u32 %v163_v17, %v162_v14  ;;  %v169_v28 = vshrl.u32 %v510_v43, %v154_v6  ;;  %v95_v24 = vsel %vm93_vm6, %v94_v20, %v568_v4  ;;  %vm171_vm7 = vcmp.lt.s32.totalorder %v152_v5, 1 }
  0xa1   :  { %v167_v29 = vor.u32 %v166_v21, %v165_v18  ;;  %vm174_vm8 = vcmp.lt.s32.totalorder %v152_v5, 4  ;;  %v96_v30 = vadd.s32 %v95_v24, %v91_v10  ;;  %vm173_vm9 = vcmp.lt.s32.totalorder %v152_v5, 3 }
  0xa2   :  { %v170_v31 = vor.u32 %v169_v28, %v168_v22  ;;  %v176_v32 = vsel %vm174_vm8, %v164_v27, 2102212464  ;;  %v155_v33 = vshrl.u32 %v505_v26, %v154_v6  ;;  %v179_v34 = vsel %vm171_vm7, %v158_v23, %v161_v25 }
  0xa3   :  { %v180_v35 = vsel %vm174_vm8, %v167_v29, 920167782  ;;  %v183_v37 = vsel %vm171_vm7, %v161_v25, %v164_v27  ;;  %v97_v38 = vadd.s32 536870912, %v96_v30  ;;  %vm172_vm10 = vcmp.lt.s32.totalorder %v152_v5, 2 }
  0xa4   :  { %v181_v36 = vsel %vm173_vm9, %v164_v27, %v180_v35  ;;  %v184_v39 = vsel %vm174_vm8, %v170_v31, 1326507024  ;;  %v175_v40 = vsel %vm171_vm7, %v155_v33, %v158_v23  ;;  %v177_v41 = vsel %vm173_vm9, %v161_v25, %v176_v32 }
  0xa5   :  { %v182_v42 = vsel %vm172_vm10, %v179_v34, %v181_v36  ;;  %v185_v43 = vsel %vm173_vm9, %v167_v29, %v184_v39  ;;  %v98_v44 = vshrl.u32 %v97_v38, 30  ;;  %v178_v50 = vsel %vm172_vm10, %v175_v40, %v177_v41 }
  0xa6   :  { %v186_v45 = vsel %vm172_vm10, %v183_v37, %v185_v43  ;;  %v578_v46 = vmul.u32.u64.low %v187_v9, %v182_v42  ;;  %v579_v47 = vmul.u32.u64.high %v187_v9, %v182_v42, %v578_v46  ;;  %v194_v53 = vmul.u32 %v187_v9, %v178_v50 }
  0xa7   :  { %v581_v48 = vmul.u32.u64.low %v187_v9, %v186_v45  ;;  %v582_v49 = vmul.u32.u64.high %v187_v9, %v186_v45, %v581_v48  ;;  %v99_v26 = vshll.u32 %v98_v44, 30  ;;  %v92_v1 = vadd.s32 %v567_v3, %v564_v2 }
  0xa8   :  { %v197_v52 = vadd.s32 1, %v579_v47  ;;  %v122_v23 = vsub.s32 4, %v98_v44  ;;  %vm140_vm1 = vcmp.le.f32.partialorder %v139_v19, 0.7853982  ;;  %vm450_vm2 = vcmask 64512  }
  0xa9   :  { %v100_v51 = vsub.s32 %v96_v30, %v99_v26  ;;  %vm196_vm11 = vc.u32 %v582_v49, %v578_v46  ;;  %v195_v2 = vadd.s32 %v578_v46, %v582_v49  ;;  %vm128_vm9 = vweird.f32 %v540_v7 }
  0xaa   :  { %v198_v55 = vsel %vm196_vm11, %v197_v52, %v579_v47  ;;  %v123_v32 = vsel %vm38_vm14, %v122_v23, %v98_v44 }
  0xab   :  { %v102_v54 = vsub.s32 0, %v100_v51  ;;  %v199_v56 = vadd.s32 %v198_v55, %v194_v53  ;;  %v125_v37 = vsel %vm37_vm15, 0, %v123_v32 }
  0xac   :  { %v335_v40 = vadd.s32 3, %v125_v37  ;;  %v129_v43 = vand.u32 3, %v125_v37 }
  0xad   :  { %v465_v57 = vmin.u32 %v102_v54, %v100_v51  ;;  %v200_v58 = vadd.s32 536870912, %v199_v56 }
  0xae   :  { %v336_v46 = vand.u32 3, %v335_v40  ;;  %vm134_vm3 = vcmp.eq.s32.totalorder %v129_v43, 2  ;;  %vm131_vm5 = vcmp.eq.s32.totalorder %v129_v43, 0  ;;  %vm130_vm7 = vcmp.lt.s32.totalorder %v129_v43, 2 }
  0xaf   :  { %v104_v59 = vclz %v465_v57  ;;  %v201_v60 = vshrl.u32 %v200_v58, 30 }
  0xb0   :  { %vm341_vm4 = vcmp.eq.s32.totalorder %v336_v46, 2  ;;  %vm338_vm6 = vcmp.eq.s32.totalorder %v336_v46, 0  ;;  %vm337_vm8 = vcmp.lt.s32.totalorder %v336_v46, 2 }
  0xb1   :  { %v466_v61 = vadd.s32 4294967294, %v104_v59  ;;  %v202_v62 = vshll.u32 %v201_v60, 30  ;;  %v225_v42 = vsub.s32 4, %v201_v60 }
  0xb3   :  { %vm467_vm12 = vcmp.lt.s32.totalorder %v466_v61, 0  ;;  %v203_v0 = vsub.s32 %v199_v56, %v202_v62  ;;  %v226_v44 = vsel %vm141_vm0, %v225_v42, %v201_v60 }
  0xb4   :  { %v107_v63 = vsel %vm467_vm12, 0, %v466_v61 }
  0xb5   :  { %v108_v4 = vsub.s32 32, %v107_v63  ;;  %v112_v5 = vsub.s32 4294967266, %v107_v63  ;;  %v205_v6 = vsub.s32 0, %v203_v0  ;;  %v109_v9 = vshll.u32 %v100_v51, %v107_v63 }
  0xb6   :  { %v228_v51 = vsel %vm140_vm1, 0, %v226_v44 }
  0xb7   :  { %v110_v10 = vshrl.u32 %v92_v1, %v108_v4  ;;  %v113_v11 = vadd.s32 127, %v112_v5  ;;  %v469_v13 = vmin.u32 %v205_v6, %v203_v0  ;;  %v439_v57 = vadd.s32 3, %v228_v51 }
  0xb8   :  { %v232_v60 = vand.u32 3, %v228_v51 }
  0xb9   :  { %v111_v14 = vor.u32 %v110_v10, %v109_v9  ;;  %v114_v15 = vshll.u32 %v113_v11, 23  ;;  %v207_v16 = vclz %v469_v13  ;;  %v440_v61 = vand.u32 3, %v439_v57 }
  0xba   :  { %vm237_vm10 = vcmp.eq.s32.totalorder %v232_v60, 2  ;;  %vm234_vm12 = vcmp.eq.s32.totalorder %v232_v60, 0 }
  0xbb   :  { %v115_v17 = vor.u32 4788187, %v114_v15  ;;  %v470_v18 = vadd.s32 4294967294, %v207_v16  ;;  %v118_v21 = vcvt.s32.f32 %v111_v14  ;;  %vm445_vm11 = vcmp.eq.s32.totalorder %v440_v61, 2 }
  0xbd   :  { %v116_v20 = vand.u32 2147483647, %v115_v17  ;;  %vm471_vm13 = vcmp.lt.s32.totalorder %v470_v18, 0 }
  0xbe   :  { %v210_v25 = vsel %vm471_vm13, 0, %v470_v18  ;;  %vm442_vm13 = vcmp.eq.s32.totalorder %v440_v61, 0 }
  0xbf   :  { %v119_v22 = vmul.f32 %v118_v21, %v116_v20  ;;  %v211_v3 = vsub.s32 32, %v210_v25  ;;  %v215_v27 = vsub.s32 4294967266, %v210_v25  ;;  %v212_v24 = vshll.u32 %v203_v0, %v210_v25 }
  0xc1   :  { %v120_v28 = vxor.u32 2147483648, %v119_v22  ;;  %v213_v29 = vshrl.u32 %v195_v2, %v211_v3  ;;  %v216_v30 = vadd.s32 127, %v215_v27 }
  0xc3   :  { %v121_v31 = vsel %vm38_vm14, %v120_v28, %v119_v22  ;;  %v214_v34 = vor.u32 %v213_v29, %v212_v24  ;;  %v217_v35 = vshll.u32 %v216_v30, 23  ;;  %vm233_vm14 = vcmp.lt.s32.totalorder %v232_v60, 2 }
  0xc4   :  { %v124_v33 = vsel %vm37_vm15, %v540_v7, %v121_v31  ;;  %vm441_vm15 = vcmp.lt.s32.totalorder %v440_v61, 2 }
  0xc5   :  { %496 = vcosq.f32 %v124_v33  ;;  %v218_v38 = vor.u32 4788187, %v217_v35  ;;  %v221_v39 = vcvt.s32.f32 %v214_v34 }
  0xc6   :  { %498 = vsinq.f32 %v124_v33 }
  0xc7   :  { %v219_v36 = vand.u32 2147483647, %v218_v38 }
  0xc9   :  { %v222_v41 = vmul.f32 %v221_v39, %v219_v36 }
  0xcb   :  { %v223_v45 = vxor.u32 2147483648, %v222_v41 }
  0xcd   :  { %v224_v8 = vsel %vm141_vm0, %v223_v45, %v222_v41  ;;  %vm231_vm0 = vweird.f32 %v544_v12 }
  0xce   :  { %v227_v48 = vsel %vm140_vm1, %v544_v12, %v224_v8 }
  0xcf   :  { %v497_v47 = vpop.eup %496  ;;  %500 = vcosq.f32 %v227_v48 }
  0xd0   :  { %v499_v49 = vpop.eup %498  ;;  %v135_v26 = vxor.u32 2147483648, %v497_v47  ;;  %502 = vsinq.f32 %v227_v48 }
  0xd1   :  { %v132_v50 = vxor.u32 2147483648, %v499_v49 }
  0xd2   :  { %v136_v52 = vsel %vm134_vm3, %v135_v26, %v499_v49  ;;  %v343_v53 = vsel %vm341_vm4, %v135_v26, %v499_v49 }
  0xd3   :  { %v133_v19 = vsel %vm131_vm5, %v497_v47, %v132_v50  ;;  %v340_v54 = vsel %vm338_vm6, %v497_v47, %v132_v50 }
  0xd4   :  { %v137_v55 = vsel %vm130_vm7, %v133_v19, %v136_v52  ;;  %v344_v56 = vsel %vm337_vm8, %v340_v54, %v343_v53 }
  0xd5   :  { %v138_v58 = vsel %vm128_vm9, nan, %v137_v55  ;;  %v345_v59 = vsel %vm128_vm9, nan, %v344_v56 }
  0xd6   :  { %451 = vst.msk [vmem:[%s618_s2] sm:$0xff] %vm450_vm2, %v138_v58  ;;  %453 = vst.msk [vmem:[%s619_s3] sm:$0xff] %vm450_vm2, %v345_v59 }
  0xd9   :  { %v501_v62 = vpop.eup %500 }
  0xda   :  { %v503_v63 = vpop.eup %502  ;;  %v238_v7 = vxor.u32 2147483648, %v501_v62 }
  0xdb   :  { %v235_v0 = vxor.u32 2147483648, %v503_v63 }
  0xdc   :  { %v239_v1 = vsel %vm237_vm10, %v238_v7, %v503_v63  ;;  %v447_v4 = vsel %vm445_vm11, %v238_v7, %v503_v63 }
  0xdd   :  { %v236_v5 = vsel %vm234_vm12, %v501_v62, %v235_v0  ;;  %v444_v6 = vsel %vm442_vm13, %v501_v62, %v235_v0 }
  0xde   :  { %v240_v9 = vsel %vm233_vm14, %v236_v5, %v239_v1  ;;  %v448_v10 = vsel %vm441_vm15, %v444_v6, %v447_v4 }
  0xdf   :  { %v241_v11 = vsel %vm231_vm0, nan, %v240_v9  ;;  %v449_v13 = vsel %vm231_vm0, nan, %v448_v10 }
  0xe0   :  { %452 = vst.msk [vmem:[%s618_s2 + $0x8] sm:$0xff] %vm450_vm2, %v241_v11  ;;  %454 = vst.msk [vmem:[%s619_s3 + $0x8] sm:$0xff] %vm450_vm2, %v449_v13 }

</bundles_post_ra>
